<compile_context>
chip_gen: v7x
topology: tpu7x:2x2x1
jax: 0.10.0
libtpu: 0.0.40
codegen_flags: <defaults>
</compile_context>

<pallas_src>
import functools

import jax
import jax.numpy as jnp
from jax.experimental import pallas as pl
from jax.experimental.pallas import tpu as pltpu


def _round_up(x: int, m: int) -> int:
    return ((x + m - 1) // m) * m


def _sublane(dtype) -> int:
    return {1: 32, 2: 16, 4: 8}.get(jnp.dtype(dtype).itemsize, 8)


def _mh_loc_kernel(x_ref, w_ref, b_ref, o_ref):
    # x_ref: [TM, D], w_ref: [D, N], b_ref: [1, N], o_ref: [TM, N]
    acc = jnp.dot(x_ref[...], w_ref[...], preferred_element_type=jnp.float32)
    o_ref[...] = (acc + b_ref[...]).astype(o_ref.dtype)


def _select_tiling(M: int, D: int, N: int, dtype,
                   desired: int = 2048, budget_bytes: int = 24 << 20):
    """Pick a row tile TM and grid size.

    - TM is a multiple of the dtype sublane count and fits a VMEM budget that
      is safe on every generation (v7x: 64 MiB physical per TC).
    - When M spans more than one tile, the tile count is rounded up to an even
      number with near-equal tiles so v7x can split the grid across its two
      TensorCores without one core doing a tiny remainder tile.
    - VMEM estimate uses lane/sublane-padded footprints (an (TM, 16) f32 tile
      still occupies 128 lanes of VMEM).
    """
    itemsize = jnp.dtype(dtype).itemsize
    sub = _sublane(dtype)
    Dp = _round_up(D, 128)
    Np = _round_up(N, 128)

    def vmem_est(t):
        # double-buffered X and O tiles + (pipelined) resident W and bias
        return itemsize * (2 * t * Dp + 2 * t * Np + 2 * Dp * Np + 2 * sub * Np)

    tm = _round_up(min(desired, _round_up(M, sub)), sub)
    while tm > 2 * sub and vmem_est(tm) > budget_bytes:
        tm = _round_up(max(tm // 2, sub), sub)

    n_tiles = pl.cdiv(M, tm)
    if M > 2 * sub and n_tiles >= 1:
        # Balance across (up to) 2 TensorCores: even tile count, equal tiles.
        n_tiles = max(2, n_tiles)
        if n_tiles % 2:
            n_tiles += 1
        tm = _round_up(pl.cdiv(M, n_tiles), sub)

    grid_m = pl.cdiv(M, tm)
    return tm, grid_m, vmem_est(tm)


@functools.partial(jax.jit, static_argnames=("num_hypothesis", "output_dim"))
def mh_localization_output(x, weights, biases, *, num_hypothesis, output_dim):
    """x: [B, T, D]; weights: [D, K*output_dim]; biases: [K*output_dim].

    Returns stacked DOA hypotheses of shape [B, T, K, output_dim].
    """
    B, T, D = x.shape
    N = num_hypothesis * output_dim
    M = B * T
    itemsize = jnp.dtype(x.dtype).itemsize

    TM, grid_m, vmem_bytes = _select_tiling(M, D, N, x.dtype)

    x2d = x.reshape(M, D)
    b2d = biases.reshape(1, N)

    cost = pl.CostEstimate(
        flops=2 * M * D * N,
        transcendentals=0,
        bytes_accessed=itemsize * (M * D + D * N + M * N + N),
    )

    # Derive the scoped-VMEM request from the actual estimate (2x margin),
    # staying well inside v7x's 64 MiB physical VMEM per TensorCore.
    vmem_limit = int(min(48 << 20, max(16 << 20, 2 * vmem_bytes)))

    out2d = pl.pallas_call(
        _mh_loc_kernel,
        out_shape=jax.ShapeDtypeStruct((M, N), x.dtype),
        grid=(grid_m,),
        in_specs=[
            pl.BlockSpec((TM, D), lambda i: (i, 0)),   # X: tiled over M (ragged OK)
            pl.BlockSpec((D, N), lambda i: (0, 0)),    # W: resident
            pl.BlockSpec((1, N), lambda i: (0, 0)),    # bias: resident
        ],
        out_specs=pl.BlockSpec((TM, N), lambda i: (i, 0)),
        compiler_params=pltpu.CompilerParams(
            dimension_semantics=("parallel",),          # shard M over TCs (v7x)
            vmem_limit_bytes=vmem_limit,
        ),
        cost_estimate=cost,
    )(x2d, weights, b2d)

    return out2d.reshape(B, T, num_hypothesis, output_dim)


def init_params(key, input_dim, num_hypothesis, output_dim=2, dtype=jnp.float32):
    """Deterministic init matching nn.Linear's uniform(-1/sqrt(D), 1/sqrt(D)).

    Returns weights [D, K*output_dim], biases [K*output_dim] — the per-hypothesis
    Linear layers concatenated along the output axis.
    """
    bound = 1.0 / (input_dim ** 0.5)
    ws, bs = [], []
    for _ in range(num_hypothesis):
        kw, kb, key = jax.random.split(key, 3)
        w_k = jax.random.uniform(kw, (input_dim, output_dim), dtype,
                                 minval=-bound, maxval=bound)
        b_k = jax.random.uniform(kb, (output_dim,), dtype,
                                 minval=-bound, maxval=bound)
        ws.append(w_k)
        bs.append(b_k)
    weights = jnp.concatenate(ws, axis=1)          # [D, K*output_dim]
    biases = jnp.concatenate(bs, axis=0)           # [K*output_dim]
    return weights, biases


def reference_forward(x, weights, biases, num_hypothesis, output_dim):
    """Pure-JAX reference mimicking the PyTorch loop-and-stack."""
    B, T, D = x.shape
    outs = []
    for k in range(num_hypothesis):
        w_k = weights[:, k * output_dim:(k + 1) * output_dim]
        b_k = biases[k * output_dim:(k + 1) * output_dim]
        outs.append(x.reshape(-1, D) @ w_k + b_k)
    stacked = jnp.stack(outs, axis=-2)             # [B*T, K, output_dim]
    return stacked.reshape(B, T, num_hypothesis, output_dim)


if __name__ == "__main__":
    key = jax.random.PRNGKey(0)

    # Small case matching the module defaults (single tile, N < 128 masked store).
    B, T, D = 2, 8, 32
    K, OUT = 4, 2
    kx, kp, key = jax.random.split(key, 3)
    x = jax.random.normal(kx, (B, T, D), jnp.float32)
    weights, biases = init_params(kp, D, K, OUT)

    out = mh_localization_output(x, weights, biases,
                                 num_hypothesis=K, output_dim=OUT)
    out = jax.block_until_ready(out)
    ref = reference_forward(x, weights, biases, K, OUT)
    assert out.shape == (B, T, K, OUT), out.shape
    assert jnp.allclose(out, ref, atol=1e-5, rtol=1e-5), "mismatch vs reference (small)"

    # Larger case exercising balanced M tiling across a 2-tile grid (no pads,
    # no output slicing) and the ragged-grid path when M % TM != 0.
    B2, T2, D2 = 4, 300, 256
    K2, OUT2 = 8, 2
    kx2, kp2, key = jax.random.split(key, 3)
    x2 = jax.random.normal(kx2, (B2, T2, D2), jnp.float32)
    w2, b2 = init_params(kp2, D2, K2, OUT2)

    out2 = mh_localization_output(x2, w2, b2, num_hypothesis=K2, output_dim=OUT2)
    out2 = jax.block_until_ready(out2)
    ref2 = reference_forward(x2, w2, b2, K2, OUT2)
    assert out2.shape == (B2, T2, K2, OUT2), out2.shape
    assert jnp.allclose(out2, ref2, atol=1e-4, rtol=1e-4), "mismatch vs reference (tiled)"

    print("KERNEL_OK")
</pallas_src>

<mosaic_0001>
module attributes {stable_mosaic.version = 11 : i64} {
  func.func @_mh_loc_kernel(%arg0: i32, %arg1: memref<16x32xf32, #tpu.memory_space<vmem>>, %arg2: memref<32x8xf32, #tpu.memory_space<vmem>>, %arg3: memref<1x8xf32, #tpu.memory_space<vmem>>, %arg4: memref<16x8xf32, #tpu.memory_space<vmem>>) attributes {dimension_semantics = [#tpu.dimension_semantics<parallel>], iteration_bounds = array<i64: 1>, scalar_prefetch = 0 : i64, scratch_operands = 0 : i64, tpu.core_type = #tpu.core_type<tc>, window_params = [{transform_indices = @transform_0, window_bounds = array<i64: 16, 32>}, {pipeline_mode = #tpu.pipeline_mode<synchronous>, transform_indices = @transform_1, window_bounds = array<i64: 32, 8>}, {pipeline_mode = #tpu.pipeline_mode<synchronous>, transform_indices = @transform_2, window_bounds = array<i64: 1, 8>}, {transform_indices = @transform_3, window_bounds = array<i64: 16, 8>}]} {
    %c0 = arith.constant 0 : index
    %c0_0 = arith.constant 0 : index
    %0 = vector.load %arg1[%c0, %c0_0] : memref<16x32xf32, #tpu.memory_space<vmem>>, vector<16x32xf32>
    %c0_1 = arith.constant 0 : index
    %c0_2 = arith.constant 0 : index
    %1 = vector.load %arg2[%c0_1, %c0_2] : memref<32x8xf32, #tpu.memory_space<vmem>>, vector<32x8xf32>
    %cst = arith.constant dense<0.000000e+00> : vector<16x8xf32>
    %2 = tpu.matmul %0, %1, %cst {dimension_numbers = #tpu.dot_dimension_numbers<[1], [0], [0], [1], [0, 0, 1, 1], [], []>} : vector<16x32xf32>, vector<32x8xf32>, vector<16x8xf32> -> vector<16x8xf32>
    %c0_3 = arith.constant 0 : index
    %c0_4 = arith.constant 0 : index
    %3 = vector.load %arg3[%c0_3, %c0_4] : memref<1x8xf32, #tpu.memory_space<vmem>>, vector<1x8xf32>
    %4 = vector.broadcast %3 : vector<1x8xf32> to vector<16x8xf32>
    %5 = arith.addf %2, %4 : vector<16x8xf32>
    %c0_5 = arith.constant 0 : index
    %c0_6 = arith.constant 0 : index
    %6 = vector.load %arg4[%c0_5, %c0_6] : memref<16x8xf32, #tpu.memory_space<vmem>>, vector<16x8xf32>
    tpu.vector_store %arg4[%c0_5, %c0_6], %5 {strides = array<i32>} : memref<16x8xf32, #tpu.memory_space<vmem>>, vector<16x8xf32>,
    return
  }
  func.func @transform_0(%arg0: i32) -> (i32, i32) {
    %c0_i32 = arith.constant 0 : i32
    %c0_i32_0 = arith.constant 0 : i32
    return %arg0, %c0_i32 : i32, i32
  }
  func.func @transform_1(%arg0: i32) -> (i32, i32) {
    %c0_i32 = arith.constant 0 : i32
    %c0_i32_0 = arith.constant 0 : i32
    %c0_i32_1 = arith.constant 0 : i32
    return %c0_i32, %c0_i32_0 : i32, i32
  }
  func.func @transform_2(%arg0: i32) -> (i32, i32) {
    %c0_i32 = arith.constant 0 : i32
    %c0_i32_0 = arith.constant 0 : i32
    %c0_i32_1 = arith.constant 0 : i32
    return %c0_i32, %c0_i32_0 : i32, i32
  }
  func.func @transform_3(%arg0: i32) -> (i32, i32) {
    %c0_i32 = arith.constant 0 : i32
    %c0_i32_0 = arith.constant 0 : i32
    return %arg0, %c0_i32 : i32, i32
  }
}

</mosaic_0001>

<bundles_post_ra>
// kernel: mh_localization_output.1
= control target key start
LH: loop header
LB: loop body
LE: loop exit
PB: predicated region body
PF: predicated region fallthrough
CT: control target
= control target key end

     0   :  { %vm27_vm0 = vcmask 261120   ;;  %vm109_vm1 = vcmask 64512   ;;  %s191_s1 = inlined_call_operand.vmem [shape: f32[32,8], index: 1, kind: input, shape index: {}]   ;;  %s192_s0 = inlined_call_operand.vmem [shape: f32[16,32], index: 0, kind: input, shape index: {}]   ;;  %s193_s2 = inlined_call_operand.vmem [shape: f32[1,8], index: 2, kind: input, shape index: {}]   ;;  %s194_s3 = inlined_call_operand.vmem [shape: f32[16,8], index: 3, kind: output, shape index: {}]  }
   0x1   :  { %v16_v0 = vld [vmem:[%s191_s1] sm:$0xff]  ;;  %v17_v1 = vld [vmem:[%s191_s1 + $0x8] sm:$0xff]  ;;  %v18_v2 = vld [vmem:[%s191_s1 + $0x10] sm:$0xff] }
   0x2   :  { %v136_v3 = vpack.c.bf16 %v17_v1, %v16_v0  ;;  %v19_v4 = vld [vmem:[%s191_s1 + $0x18] sm:$0xff]  ;;  %v14_v5 = vld [vmem:[%s192_s0] sm:$0xff]  ;;  %v15_v7 = vld [vmem:[%s192_s0 + $0x8] sm:$0xff] }
   0x3   :  { %v140_v6 = vpack.c.bf16 %v19_v4, %v18_v2  ;;  %133 = vmatprep.mubr.msk.f32.mxu0 %vm27_vm0, %v14_v5  ;;  %v116_v8 = vld [vmem:[%s193_s2] ss:$0 sm:$0xff] }
   0x4   :  { %137 = vmatprep.subr.bf16.mxu0 %v136_v3 }
   0x5   :  { %139 = vmatpush3.bf16.msra.mxu0 %v136_v3 }
   0x6   :  { %141 = vmatprep.subr.bf16.mxu0 %v140_v6 }
   0x9   :  { %143 = vmatpush3.bf16.msra.mxu0 %v140_v6 }
   0xc   :  { %134 = vmatmul.mubr.msk.f32.vlgmr.msra.gmra.mrb[0].mxu0 %vm27_vm0, %v15_v7 }
  0xdf   :  { %v135_v9 = vpop.f32.mrb[0].mxu0 }
  0xe0   :  { %v106_v10 = vadd.f32 %v135_v9, %v116_v8  ;;  %v100_v11 = vpop.f32.mrb[1].mxu0 }
  0xe1   :  { %v101_v12 = vadd.f32 %v116_v8, %v100_v11 }
  0xe2   :  { %111 = vst.msk [vmem:[%s194_s3 + $0x8] sm:$0xff] %vm109_vm1, %v106_v10 }
  0xe3   :  { %110 = vst.msk [vmem:[%s194_s3] sm:$0xff] %vm109_vm1, %v101_v12 }

</bundles_post_ra>
